<compile_context>
chip_gen: v6e
topology: v6e:2x2x1
jax: 0.10.0
libtpu: 0.0.40
codegen_flags: <defaults>
</compile_context>

<pallas_src>
import jax
import jax.numpy as jnp
from jax.experimental import pallas as pl
from jax.experimental.pallas import tpu as pltpu


GRID_H = 28
GRID_W = 28
ROWS_PER_IMAGE = GRID_H * GRID_W      # 784
N_BATCH = 8                           # static batch; inputs padded to this
M_ROWS = N_BATCH * ROWS_PER_IMAGE     # 6272
ROW_PAD = 128                         # >= max shifted-read offset (116)
MPAD = M_ROWS + ROW_PAD               # 6400
C_PAD = 128                           # channel / feature lanes (lane-dense)
N_CLASSES = 10

_VMEM = pl.BlockSpec(memory_space=pltpu.MemorySpace.VMEM)


# ----------------------------------------------------------------------------
# One-time probe: which way does pltpu.roll move data along lanes on this HW?
# ----------------------------------------------------------------------------
def _roll_probe_kernel(x_ref, o_ref):
    o_ref[...] = pltpu.roll(x_ref[...], 1, 1)


def _roll_moves_to_higher_lanes():
    """True iff pltpu.roll(x, +s, lane_axis) moves data to higher lane indices."""
    x = jnp.broadcast_to(jnp.arange(C_PAD, dtype=jnp.float32), (8, C_PAD))
    y = pl.pallas_call(
        _roll_probe_kernel,
        out_shape=jax.ShapeDtypeStruct((8, C_PAD), jnp.float32),
        in_specs=[_VMEM],
        out_specs=_VMEM,
    )(x)
    v = float(y[0, 1])
    assert v in (0.0, 2.0), f"unexpected pltpu.roll semantics (probe value {v})"
    return v == 0.0


# ----------------------------------------------------------------------------
# The fused forward kernel
# ----------------------------------------------------------------------------
def _lenet_kernel(x_ref, w1_ref, b_ref, w2_ref, wf1_ref, wf2_ref, wf3_ref,
                  out_ref, a_scr, p_scr):
    f32, bf16 = jnp.float32, jnp.bfloat16

    # Zero ONLY the pad tails (shifted reads reach at most +116 rows past M_ROWS).
    zeros_tail = jnp.zeros((ROW_PAD, C_PAD), f32)
    a_scr[pl.ds(M_ROWS, ROW_PAD), :] = zeros_tail
    p_scr[pl.ds(M_ROWS, ROW_PAD), :] = zeros_tail

    # ---- conv1 (1->6, 3x3 valid) + ReLU: 9 shifted column reads, lane-broadcast * weight ----
    # x_ref is a compact (MPAD,1) pixel column; the multiply broadcasts it across lanes.
    acc = None
    for di in range(3):
        for dj in range(3):
            t = di * 3 + dj
            xs = x_ref[pl.ds(di * GRID_W + dj, M_ROWS), :]            # (M, 1)
            term = xs * w1_ref[t]                                     # -> (M, 128)
            acc = term if acc is None else acc + term
    a_scr[pl.ds(0, M_ROWS), :] = jnp.maximum(acc + b_ref[0], 0.0)

    # ---- pool1: 2x2 stride-2 max (valid outputs sit at even grid positions) ----
    p_scr[pl.ds(0, M_ROWS), :] = jnp.maximum(
        jnp.maximum(a_scr[pl.ds(0, M_ROWS), :], a_scr[pl.ds(1, M_ROWS), :]),
        jnp.maximum(a_scr[pl.ds(GRID_W, M_ROWS), :],
                    a_scr[pl.ds(GRID_W + 1, M_ROWS), :]))

    # ---- conv2 (6->16, 3x3 on pooled grid => dilation-2 taps) + ReLU as ONE bf16 matmul ----
    # Each tap's 6 input channels are rolled into their own lane group (pool1 lanes >= 6 are
    # exactly zero); w2 rows were packed in pack_params to match the probed roll direction.
    slab = None
    for di in range(3):
        for dj in range(3):
            t = di * 3 + dj
            ps = p_scr[pl.ds(2 * (di * GRID_W + dj), M_ROWS), :]      # (M, 128)
            if t:
                ps = pltpu.roll(ps, 6 * t, 1)
            slab = ps if slab is None else slab + ps
    conv2 = jnp.dot(slab.astype(bf16), w2_ref[...], preferred_element_type=f32)
    a_scr[pl.ds(0, M_ROWS), :] = jnp.maximum(conv2 + b_ref[1], 0.0)

    # ---- pool2 + 5x5 gather + fc1, fused: per valid pool2 position, 4 strided (8,128)
    # batch reads -> max -> dot-accumulate against wf1[f]. No feat scratch, no pool2 slab.
    acc = None
    for i in range(5):
        for j in range(5):
            f = i * 5 + j
            base = 4 * i * GRID_W + 4 * j
            p2 = jnp.maximum(
                jnp.maximum(
                    a_scr[pl.ds(base, N_BATCH, stride=ROWS_PER_IMAGE), :],
                    a_scr[pl.ds(base + 2, N_BATCH, stride=ROWS_PER_IMAGE), :]),
                jnp.maximum(
                    a_scr[pl.ds(base + 2 * GRID_W, N_BATCH, stride=ROWS_PER_IMAGE), :],
                    a_scr[pl.ds(base + 2 * GRID_W + 2, N_BATCH, stride=ROWS_PER_IMAGE), :]))
            term = jnp.dot(p2, wf1_ref[f].astype(f32), preferred_element_type=f32)
            acc = term if acc is None else acc + term
    h1 = jnp.maximum(acc + b_ref[2], 0.0)                              # (8, 128)

    # ---- fc2 -> fc3 -> masked softmax (tiny matmuls; bf16-stored weights, f32 accumulate) ----
    h2 = jnp.maximum(
        jnp.dot(h1, wf2_ref[...].astype(f32), preferred_element_type=f32) + b_ref[3], 0.0)
    logits = jnp.dot(h2, wf3_ref[...].astype(f32), preferred_element_type=f32) + b_ref[4]

    lane = jax.lax.broadcasted_iota(jnp.int32, logits.shape, 1)
    z = logits - jnp.max(logits, axis=-1, keepdims=True)
    e = jnp.where(lane < N_CLASSES, jnp.exp(z), 0.0)
    out_ref[...] = e * pl.reciprocal(jnp.sum(e, axis=-1, keepdims=True), approx=False)


# ----------------------------------------------------------------------------
# Wrapper: one pallas_call per forward (batch statically padded to 8)
# ----------------------------------------------------------------------------
def lenet_forward(packed, x):
    n, c, h, w = x.shape
    assert (c, h, w) == (1, GRID_H, GRID_W) and 1 <= n <= N_BATCH

    xp = jnp.zeros((N_BATCH, ROWS_PER_IMAGE), jnp.float32)
    xp = xp.at[:n].set(x.reshape(n, ROWS_PER_IMAGE).astype(jnp.float32))
    x_col = jnp.pad(xp.reshape(N_BATCH * ROWS_PER_IMAGE, 1), ((0, ROW_PAD), (0, 0)))

    out = pl.pallas_call(
        _lenet_kernel,
        out_shape=jax.ShapeDtypeStruct((N_BATCH, C_PAD), jnp.float32),
        in_specs=[_VMEM] * 7,
        out_specs=_VMEM,
        scratch_shapes=[pltpu.VMEM((MPAD, C_PAD), jnp.float32),
                        pltpu.VMEM((MPAD, C_PAD), jnp.float32)],
        compiler_params=pltpu.CompilerParams(vmem_limit_bytes=48 * 1024 * 1024),
    )(x_col, packed["w1"], packed["b"], packed["w2"],
      packed["wf1"], packed["wf2"], packed["wf3"])
    return out[:n, :N_CLASSES]


net_forward = jax.jit(lenet_forward)


# ----------------------------------------------------------------------------
# Parameter init (PyTorch-style uniform) and one-time packing/padding
# ----------------------------------------------------------------------------
def init_params(key):
    ks = jax.random.split(key, 10)

    def u(k, shape, fan_in):
        bound = 1.0 / jnp.sqrt(fan_in)
        return jax.random.uniform(k, shape, jnp.float32, -bound, bound)

    return {
        "conv1_w": u(ks[0], (6, 1, 3, 3), 1 * 3 * 3),
        "conv1_b": u(ks[1], (6,), 1 * 3 * 3),
        "conv2_w": u(ks[2], (16, 6, 3, 3), 6 * 3 * 3),
        "conv2_b": u(ks[3], (16,), 6 * 3 * 3),
        "fc1_w": u(ks[4], (120, 400), 400),
        "fc1_b": u(ks[5], (120,), 400),
        "fc2_w": u(ks[6], (84, 120), 120),
        "fc2_b": u(ks[7], (84,), 120),
        "fc3_w": u(ks[8], (10, 84), 84),
        "fc3_b": u(ks[9], (10,), 84),
    }


def pack_params(p):
    f32, bf16 = jnp.float32, jnp.bfloat16
    roll_up = _roll_moves_to_higher_lanes()

    # conv1: w1[t, co] = conv1_w[co, 0, di, dj], t = di*3 + dj  (f32: VPU path)
    w1 = jnp.zeros((16, C_PAD), f32).at[:9, :6].set(p["conv1_w"].reshape(6, 9).T)

    # all biases in one (8,128) f32 table (rows: conv1, conv2, fc1, fc2, fc3)
    b = jnp.zeros((8, C_PAD), f32)
    b = b.at[0, :6].set(p["conv1_b"]).at[1, :16].set(p["conv2_b"])
    b = b.at[2, :120].set(p["fc1_b"]).at[3, :84].set(p["fc2_b"]).at[4, :10].set(p["fc3_b"])

    # conv2 packed along K: row must be where pltpu.roll(p1, 6t) puts input channel ci of tap t.
    w2 = jnp.zeros((C_PAD, C_PAD), f32)
    cw = p["conv2_w"]                                  # (co=16, ci=6, di, dj)
    for t in range(9):
        di, dj = divmod(t, 3)
        for ci in range(6):
            row = (6 * t + ci) if roll_up else ((ci - 6 * t) % C_PAD)
            w2 = w2.at[row, :16].set(cw[:, ci, di, dj])

    # fc1 per spatial position f = i*5+j: wf1[f, c, o] = fc1_w[o, c*25 + f]
    wf1 = jnp.zeros((25, C_PAD, C_PAD), f32).at[:, :16, :120].set(
        p["fc1_w"].reshape(120, 16, 5, 5).transpose(2, 3, 1, 0).reshape(25, 16, 120))
    wf2 = jnp.zeros((C_PAD, C_PAD), f32).at[:120, :84].set(p["fc2_w"].T)
    wf3 = jnp.zeros((C_PAD, C_PAD), f32).at[:84, :10].set(p["fc3_w"].T)

    return {"w1": w1, "b": b, "w2": w2.astype(bf16), "wf1": wf1.astype(bf16),
            "wf2": wf2.astype(bf16), "wf3": wf3.astype(bf16)}


# ----------------------------------------------------------------------------
# Pure-JAX reference (for correctness check)
# ----------------------------------------------------------------------------
def reference_forward(params, x):
    def conv(inp, w, b):
        y = jax.lax.conv_general_dilated(
            inp, w, window_strides=(1, 1), padding="VALID",
            dimension_numbers=("NCHW", "OIHW", "NCHW"))
        return y + b[None, :, None, None]

    def pool(a):
        return jax.lax.reduce_window(a, jnp.array(-jnp.inf, a.dtype), jax.lax.max,
                                     (1, 1, 2, 2), (1, 1, 2, 2), "VALID")

    h = pool(jax.nn.relu(conv(x, params["conv1_w"], params["conv1_b"])))
    h = pool(jax.nn.relu(conv(h, params["conv2_w"], params["conv2_b"])))
    h = h.reshape(h.shape[0], -1)                      # NCHW flatten == torch .view(-1, 400)
    h = jax.nn.relu(h @ params["fc1_w"].T + params["fc1_b"])
    h = jax.nn.relu(h @ params["fc2_w"].T + params["fc2_b"])
    return jax.nn.softmax(h @ params["fc3_w"].T + params["fc3_b"], axis=-1)


if __name__ == "__main__":
    key = jax.random.PRNGKey(0)
    pkey, xkey = jax.random.split(key)
    params = init_params(pkey)
    packed = pack_params(params)
    x = jax.random.normal(xkey, (3, 1, 28, 28), jnp.float32)   # matches torch.randn(3,1,28,28)

    out = jax.block_until_ready(net_forward(packed, x))
    assert out.shape == (3, 10)
    assert bool(jnp.allclose(jnp.sum(out, axis=1), 1.0, atol=1e-5))

    ref = jax.block_until_ready(reference_forward(params, x))
    err = float(jnp.max(jnp.abs(out - ref)))
    # bf16-stored MXU weights + bf16 conv2 operands -> tolerance is looser than pure f32.
    assert err < 2.5e-2, err

    # TODO(synk): NLLLoss / SGD training loop / predict / evaluate are not part of the
    # forward pass and are omitted.
    print("KERNEL_OK")
</pallas_src>

<mosaic_0001>
module attributes {stable_mosaic.version = 11 : i64} {
  func.func @_roll_probe_kernel(%arg0: memref<8x128xf32, #tpu.memory_space<vmem>>, %arg1: memref<8x128xf32, #tpu.memory_space<vmem>>) attributes {dimension_semantics = [], scalar_prefetch = 0 : i64, scratch_operands = 0 : i64, tpu.core_type = #tpu.core_type<tc>} {
    %c0 = arith.constant 0 : index
    %c0_0 = arith.constant 0 : index
    %0 = vector.load %arg0[%c0, %c0_0] : memref<8x128xf32, #tpu.memory_space<vmem>>, vector<8x128xf32>
    %c1_i32 = arith.constant 1 : i32
    %1 = tpu.dynamic_rotate %0 by %c1_i32 dim 1 : vector<8x128xf32>, i32 -> vector<8x128xf32>
    %c0_1 = arith.constant 0 : index
    %c0_2 = arith.constant 0 : index
    %2 = vector.load %arg1[%c0_1, %c0_2] : memref<8x128xf32, #tpu.memory_space<vmem>>, vector<8x128xf32>
    tpu.vector_store %arg1[%c0_1, %c0_2], %1 {strides = array<i32>} : memref<8x128xf32, #tpu.memory_space<vmem>>, vector<8x128xf32>,
    return
  }
}

</mosaic_0001>

<bundles_post_ra>
// kernel: tpu_custom_call.1
= control target key start
LH: loop header
LB: loop body
LE: loop exit
PB: predicated region body
PF: predicated region fallthrough
CT: control target
= control target key end

     0   :  { %6 = vsyncpa [#allocation3], 0  ;;  %s106_s0 = inlined_call_operand.hbm [shape: f32[8,128], index: 0, kind: input, shape index: {}]   ;;  %s107_s1 = inlined_call_operand.hbm [shape: f32[8,128], index: 1, kind: output, shape index: {}]  }
   0x1   :  { %7 = vsyncpa [#allocation4], 0  ;;  %s87_s6 = smov [#allocation2]  }
   0x2   :  { %s14_s7 = sshll.u32 %s87_s6, 4  ;;  %s15_s7 = int_to_ptr.vmem [resolvable:$true] %s14_s7 }
   0x3   :  { %s51_s8 = scalar_lea.vmem %s15_s7, 128  ;;  %p56_p1 = scmp.lt.s32.totalorder %s15_s7, %s15_s7 }
   0x4   :  { %p52_p0 = scmp.ne.s32.totalorder %s15_s7, %s51_s8  ;;  %p57_p2 = scmp.lt.s32.totalorder %s51_s8, %s51_s8 }
   0x6   :  { %p58_p3 = por %p57_p2, %p56_p1 }
   0x8   :  { %p59_p4 = pnand %p58_p3, %p52_p0 }
   0xa   :  { %62 = shalt.err (!%p59_p4)
}
   0xb   :  { %17 = dma.hbm_to_vmem [thread:$0]  %s106_s0, 128, %s15_s7, [#allocation3]  }
   0xc   :  { %83 = dma.done.wait [#allocation3], 128  }
   0xd   :  { %84 = vsyncadd [#allocation3], 4294967168  ;;  %v21_v0 = vld [vmem:[#allocation2] sm:$0xff]  ;;  %s88_s11 = smov 1   ;;  %s89_s12 = smov [#allocation5]  }
   0xe   :  { %22 = vrot.lane.b32.xlu0 %v21_v0, %s88_s11  ;;  %s31_s13 = sshll.u32 %s89_s12, 4  ;;  %s32_s13 = int_to_ptr.vmem [resolvable:$true] %s31_s13 }
   0xf   :  { %s63_s14 = scalar_lea.vmem %s32_s13, 128  ;;  %p68_p6 = scmp.lt.s32.totalorder %s32_s13, %s32_s13 }
  0x10   :  { %p64_p5 = scmp.ne.s32.totalorder %s32_s13, %s63_s14  ;;  %p69_p7 = scmp.lt.s32.totalorder %s63_s14, %s63_s14 }
  0x12   :  { %p70_p8 = por %p69_p7, %p68_p6 }
  0x14   :  { %p71_p9 = pnand %p70_p8, %p64_p5 }
  0x80   :  { %v23_v1 = vpop.permute.xlu0 %22 }
  0x81   :  { %24 = vst [vmem:[#allocation5] sm:$0xff] %v23_v1 }
  0x82   :  { %74 = shalt.err (!%p71_p9)
}
  0x83   :  { %34 = dma.vmem_to_hbm [thread:$0]  %s32_s13, 128, %s107_s1, [#allocation4]  }
  0x84   :  { %85 = dma.done.wait [#allocation4], 128  }
  0x85   :  { %86 = vsyncadd [#allocation4], 4294967168 }
  0x86   :  { %38 = vsyncpa [#allocation3], 1 }
  0x87   :  { %39 = vsyncpa [#allocation4], 1 }

</bundles_post_ra>
